<compile_context>
chip_gen: v6e
topology: v6e:2x2x1
jax: 0.10.0
libtpu: 0.0.40
codegen_flags: <defaults>
</compile_context>

<pallas_src>
import functools

import jax
import jax.numpy as jnp
from jax.experimental import pallas as pl
from jax.experimental.pallas import tpu as pltpu

# ---- module hyper-parameters (small, deterministic) -------------------------
NUM_INPUTS = 16
SHARED_LAYER_SIZES = [32, 8]
TASK_LAYER_SIZES = [3]
NUM_TASKS = 2
NUM_GAUSSIANS = 4

H0 = SHARED_LAYER_SIZES[0]                       # 32
H1 = SHARED_LAYER_SIZES[1] * NUM_GAUSSIANS       # 8 * 4 = 32 (last shared layer * G)
LG = TASK_LAYER_SIZES[0] * NUM_GAUSSIANS         # 3 * 4 = 12
D_OUT = LG * NUM_TASKS                           # 24
M = NUM_GAUSSIANS

BATCH = 16

MAX_TILE_B = 2048          # large tiles amortize per-step overhead (v5e/v6e)
SPLIT_THRESHOLD = 1024     # above this, force >=2 parallel steps (v7x megacore)


def mdn_kernel(x_ref, w0_ref, b0_ref, w1_ref, b1_ref, wt_ref, bt_ref, out_ref,
               *, num_tasks, lg, m):
    x = x_ref[...]                                                   # (TB, D_in)

    # shared layer 0 + ReLU
    h0 = jnp.dot(x, w0_ref[...], preferred_element_type=jnp.float32) + b0_ref[...]
    h0 = jnp.maximum(h0, 0.0)

    # shared layer 1 (is_MTL -> ReLU also applied here)
    h1 = jnp.dot(h0, w1_ref[...], preferred_element_type=jnp.float32) + b1_ref[...]
    h1 = jnp.maximum(h1, 0.0)

    # task layer (no activation)
    y = jnp.dot(h1, wt_ref[...], preferred_element_type=jnp.float32) + bt_ref[...]

    # ---- MDN epilogue: full-width masked compute (no slicing / concat) ------
    lane = jax.lax.broadcasted_iota(jnp.int32, y.shape, 1)           # (TB, 24)
    raw_mask = lane < 0          # all-false start (splat, not a dense constant)
    exp_mask = lane < 0
    shift = jnp.zeros_like(y)
    for t in range(num_tasks):
        lo = t * lg
        raw_mask = raw_mask | ((lane >= lo) & (lane < lo + m))
        exp_mask = exp_mask | ((lane >= lo + m) & (lane < lo + 2 * m))
        # per-segment stable-softmax max (cross-lane reduction -> XLU)
        seg_sm = (lane >= lo + 2 * m) & (lane < lo + lg)
        m_t = jnp.max(jnp.where(seg_sm, y, -jnp.inf), axis=-1, keepdims=True)
        shift = shift + jnp.where(seg_sm, m_t, 0.0)

    # ONE full-width exp: exp(y) on raw/exp lanes, exp(y - segmax) on sm lanes.
    e = jnp.exp(y - shift)
    sm_mask = jnp.logical_not(raw_mask | exp_mask)
    e_sm = jnp.where(sm_mask, e, 0.0)

    # per-segment softmax denominator (cross-lane sum, broadcast over segment)
    denom = jnp.zeros_like(y)
    for t in range(num_tasks):
        lo = t * lg
        seg = (lane >= lo) & (lane < lo + lg)
        s_t = jnp.sum(jnp.where(seg, e_sm, 0.0), axis=-1, keepdims=True)
        denom = denom + jnp.where(seg, s_t, 0.0)

    # exact divide (approx=True would use EUP vrcp; may exceed 1e-5 tolerance)
    sm_vals = e_sm * pl.reciprocal(denom, approx=False)

    out_ref[...] = jnp.where(raw_mask, y, jnp.where(exp_mask, e, sm_vals))


def _choose_tile_b(b):
    if b <= SPLIT_THRESHOLD:
        return b                 # single grid step; block == full dim, always legal
    # >=2 parallel steps so the batch axis shards across v7x's two TensorCores;
    # keep tiles large (multiple of 512) to amortize per-step overhead on v5e/v6e.
    tile = min(MAX_TILE_B, (b // 2 // 512) * 512)
    return max(tile, 512)


def mdn_net_forward(x, params):
    w0, b0, w1, b1, wt, bt = params
    b, d_in = x.shape
    assert d_in == NUM_INPUTS

    tile_b = _choose_tile_b(b)
    grid_b = pl.cdiv(b, tile_b)
    b_pad = grid_b * tile_b
    # Pad awkward batch sizes up to a tile multiple (avoids tiny-tile cliff).
    x_in = x if b_pad == b else jnp.pad(x, ((0, b_pad - b), (0, 0)))

    kernel = functools.partial(mdn_kernel, num_tasks=NUM_TASKS, lg=LG, m=M)

    flops = 2 * b_pad * (NUM_INPUTS * H0 + H0 * H1 + H1 * D_OUT)
    bytes_accessed = 4 * (b_pad * (NUM_INPUTS + D_OUT)
                          + NUM_INPUTS * H0 + H0
                          + H0 * H1 + H1
                          + H1 * D_OUT + D_OUT)
    cost = pl.CostEstimate(flops=flops,
                           transcendentals=b_pad * D_OUT,
                           bytes_accessed=bytes_accessed)

    out = pl.pallas_call(
        kernel,
        out_shape=jax.ShapeDtypeStruct((b_pad, D_OUT), jnp.float32),
        grid=(grid_b,),
        in_specs=[
            pl.BlockSpec((tile_b, NUM_INPUTS), lambda i: (i, 0)),   # x tile
            pl.BlockSpec((NUM_INPUTS, H0), lambda i: (0, 0)),       # W0 (resident)
            pl.BlockSpec((1, H0), lambda i: (0, 0)),                # b0
            pl.BlockSpec((H0, H1), lambda i: (0, 0)),               # W1
            pl.BlockSpec((1, H1), lambda i: (0, 0)),                # b1
            pl.BlockSpec((H1, D_OUT), lambda i: (0, 0)),            # Wt
            pl.BlockSpec((1, D_OUT), lambda i: (0, 0)),             # bt
        ],
        out_specs=pl.BlockSpec((tile_b, D_OUT), lambda i: (i, 0)),
        compiler_params=pltpu.CompilerParams(
            dimension_semantics=("parallel",)),
        cost_estimate=cost,
    )(x_in, w0, b0, w1, b1, wt, bt)

    if b_pad != b:
        out = out[:b]
    # x.view(-1, num_tasks, L * G): free bitcast on a contiguous (b, 24) buffer
    return out.reshape(b, NUM_TASKS, LG)


def init_params(key):
    """Deterministic synthetic parameters (weights stored as (in, out))."""
    ks = jax.random.split(key, 6)
    scale = 0.1
    w0 = scale * jax.random.normal(ks[0], (NUM_INPUTS, H0), jnp.float32)
    b0 = scale * jax.random.normal(ks[1], (1, H0), jnp.float32)
    w1 = scale * jax.random.normal(ks[2], (H0, H1), jnp.float32)
    b1 = scale * jax.random.normal(ks[3], (1, H1), jnp.float32)
    wt = scale * jax.random.normal(ks[4], (H1, D_OUT), jnp.float32)
    bt = scale * jax.random.normal(ks[5], (1, D_OUT), jnp.float32)
    return (w0, b0, w1, b1, wt, bt)


def mdn_net_reference(x, params):
    """Pure-JAX reference matching the PyTorch forward pass."""
    w0, b0, w1, b1, wt, bt = params
    h0 = jax.nn.relu(x @ w0 + b0)
    h1 = jax.nn.relu(h0 @ w1 + b1)
    y = (h1 @ wt + bt).reshape(-1, NUM_TASKS, LG)
    out = jnp.concatenate(
        [y[..., :M],
         jnp.exp(y[..., M:2 * M]),
         jax.nn.softmax(y[..., 2 * M:], axis=-1)],
        axis=-1)
    return out


if __name__ == "__main__":
    key = jax.random.PRNGKey(0)
    k_x, k_p = jax.random.split(key)
    x = jax.random.normal(k_x, (BATCH, NUM_INPUTS), jnp.float32)
    params = init_params(k_p)

    out = mdn_net_forward(x, params)
    out = jax.block_until_ready(out)

    ref = mdn_net_reference(x, params)
    assert out.shape == (BATCH, NUM_TASKS, LG)
    assert jnp.allclose(out, ref, atol=1e-5, rtol=1e-5)

    print("KERNEL_OK")
</pallas_src>

<mosaic_0001>
module attributes {stable_mosaic.version = 11 : i64} {
  func.func @mdn_kernel(%arg0: i32, %arg1: memref<16x16xf32, #tpu.memory_space<vmem>>, %arg2: memref<16x32xf32, #tpu.memory_space<vmem>>, %arg3: memref<1x32xf32, #tpu.memory_space<vmem>>, %arg4: memref<32x32xf32, #tpu.memory_space<vmem>>, %arg5: memref<1x32xf32, #tpu.memory_space<vmem>>, %arg6: memref<32x24xf32, #tpu.memory_space<vmem>>, %arg7: memref<1x24xf32, #tpu.memory_space<vmem>>, %arg8: memref<16x24xf32, #tpu.memory_space<vmem>>) attributes {dimension_semantics = [#tpu.dimension_semantics<parallel>], iteration_bounds = array<i64: 1>, scalar_prefetch = 0 : i64, scratch_operands = 0 : i64, tpu.core_type = #tpu.core_type<tc>, window_params = [{transform_indices = @transform_0, window_bounds = array<i64: 16, 16>}, {pipeline_mode = #tpu.pipeline_mode<synchronous>, transform_indices = @transform_1, window_bounds = array<i64: 16, 32>}, {pipeline_mode = #tpu.pipeline_mode<synchronous>, transform_indices = @transform_2, window_bounds = array<i64: 1, 32>}, {pipeline_mode = #tpu.pipeline_mode<synchronous>, transform_indices = @transform_3, window_bounds = array<i64: 32, 32>}, {pipeline_mode = #tpu.pipeline_mode<synchronous>, transform_indices = @transform_4, window_bounds = array<i64: 1, 32>}, {pipeline_mode = #tpu.pipeline_mode<synchronous>, transform_indices = @transform_5, window_bounds = array<i64: 32, 24>}, {pipeline_mode = #tpu.pipeline_mode<synchronous>, transform_indices = @transform_6, window_bounds = array<i64: 1, 24>}, {transform_indices = @transform_7, window_bounds = array<i64: 16, 24>}]} {
    %c0 = arith.constant 0 : index
    %c0_0 = arith.constant 0 : index
    %0 = vector.load %arg1[%c0, %c0_0] : memref<16x16xf32, #tpu.memory_space<vmem>>, vector<16x16xf32>
    %c0_1 = arith.constant 0 : index
    %c0_2 = arith.constant 0 : index
    %1 = vector.load %arg2[%c0_1, %c0_2] : memref<16x32xf32, #tpu.memory_space<vmem>>, vector<16x32xf32>
    %cst = arith.constant dense<0.000000e+00> : vector<16x32xf32>
    %2 = tpu.matmul %0, %1, %cst {dimension_numbers = #tpu.dot_dimension_numbers<[1], [0], [0], [1], [0, 0, 1, 1], [], []>} : vector<16x16xf32>, vector<16x32xf32>, vector<16x32xf32> -> vector<16x32xf32>
    %c0_3 = arith.constant 0 : index
    %c0_4 = arith.constant 0 : index
    %3 = vector.load %arg3[%c0_3, %c0_4] : memref<1x32xf32, #tpu.memory_space<vmem>>, vector<1x32xf32>
    %4 = vector.broadcast %3 : vector<1x32xf32> to vector<16x32xf32>
    %5 = arith.addf %2, %4 : vector<16x32xf32>
    %cst_5 = arith.constant 0.000000e+00 : f32
    %6 = vector.broadcast %cst_5 : f32 to vector<16x32xf32>
    %7 = arith.maximumf %5, %6 : vector<16x32xf32>
    %c0_6 = arith.constant 0 : index
    %c0_7 = arith.constant 0 : index
    %8 = vector.load %arg4[%c0_6, %c0_7] : memref<32x32xf32, #tpu.memory_space<vmem>>, vector<32x32xf32>
    %cst_8 = arith.constant dense<0.000000e+00> : vector<16x32xf32>
    %9 = tpu.matmul %7, %8, %cst_8 {dimension_numbers = #tpu.dot_dimension_numbers<[1], [0], [0], [1], [0, 0, 1, 1], [], []>} : vector<16x32xf32>, vector<32x32xf32>, vector<16x32xf32> -> vector<16x32xf32>
    %c0_9 = arith.constant 0 : index
    %c0_10 = arith.constant 0 : index
    %10 = vector.load %arg5[%c0_9, %c0_10] : memref<1x32xf32, #tpu.memory_space<vmem>>, vector<1x32xf32>
    %11 = vector.broadcast %10 : vector<1x32xf32> to vector<16x32xf32>
    %12 = arith.addf %9, %11 : vector<16x32xf32>
    %cst_11 = arith.constant 0.000000e+00 : f32
    %13 = vector.broadcast %cst_11 : f32 to vector<16x32xf32>
    %14 = arith.maximumf %12, %13 : vector<16x32xf32>
    %c0_12 = arith.constant 0 : index
    %c0_13 = arith.constant 0 : index
    %15 = vector.load %arg6[%c0_12, %c0_13] : memref<32x24xf32, #tpu.memory_space<vmem>>, vector<32x24xf32>
    %cst_14 = arith.constant dense<0.000000e+00> : vector<16x24xf32>
    %16 = tpu.matmul %14, %15, %cst_14 {dimension_numbers = #tpu.dot_dimension_numbers<[1], [0], [0], [1], [0, 0, 1, 1], [], []>} : vector<16x32xf32>, vector<32x24xf32>, vector<16x24xf32> -> vector<16x24xf32>
    %c0_15 = arith.constant 0 : index
    %c0_16 = arith.constant 0 : index
    %17 = vector.load %arg7[%c0_15, %c0_16] : memref<1x24xf32, #tpu.memory_space<vmem>>, vector<1x24xf32>
    %18 = vector.broadcast %17 : vector<1x24xf32> to vector<16x24xf32>
    %19 = arith.addf %16, %18 : vector<16x24xf32>
    %20 = tpu.iota {dimensions = array<i32: 1>} : vector<16x24xi32>
    %c0_i32 = arith.constant 0 : i32
    %21 = vector.broadcast %c0_i32 : i32 to vector<16x24xi32>
    %22 = arith.cmpi slt, %20, %21 : vector<16x24xi32>
    %c0_i32_17 = arith.constant 0 : i32
    %23 = vector.broadcast %c0_i32_17 : i32 to vector<16x24xi32>
    %24 = arith.cmpi slt, %20, %23 : vector<16x24xi32>
    %cst_18 = arith.constant 0.000000e+00 : f32
    %25 = vector.broadcast %cst_18 : f32 to vector<16x24xf32>
    %c0_i32_19 = arith.constant 0 : i32
    %26 = vector.broadcast %c0_i32_19 : i32 to vector<16x24xi32>
    %27 = arith.cmpi sge, %20, %26 : vector<16x24xi32>
    %c4_i32 = arith.constant 4 : i32
    %28 = vector.broadcast %c4_i32 : i32 to vector<16x24xi32>
    %29 = arith.cmpi slt, %20, %28 : vector<16x24xi32>
    %30 = arith.andi %27, %29 : vector<16x24xi1>
    %31 = arith.ori %22, %30 : vector<16x24xi1>
    %c4_i32_20 = arith.constant 4 : i32
    %32 = vector.broadcast %c4_i32_20 : i32 to vector<16x24xi32>
    %33 = arith.cmpi sge, %20, %32 : vector<16x24xi32>
    %c8_i32 = arith.constant 8 : i32
    %34 = vector.broadcast %c8_i32 : i32 to vector<16x24xi32>
    %35 = arith.cmpi slt, %20, %34 : vector<16x24xi32>
    %36 = arith.andi %33, %35 : vector<16x24xi1>
    %37 = arith.ori %24, %36 : vector<16x24xi1>
    %c8_i32_21 = arith.constant 8 : i32
    %38 = vector.broadcast %c8_i32_21 : i32 to vector<16x24xi32>
    %39 = arith.cmpi sge, %20, %38 : vector<16x24xi32>
    %c12_i32 = arith.constant 12 : i32
    %40 = vector.broadcast %c12_i32 : i32 to vector<16x24xi32>
    %41 = arith.cmpi slt, %20, %40 : vector<16x24xi32>
    %42 = arith.andi %39, %41 : vector<16x24xi1>
    %cst_22 = arith.constant 0xFF800000 : f32
    %43 = vector.broadcast %cst_22 : f32 to vector<16x24xf32>
    %44 = arith.select %42, %19, %43 : vector<16x24xi1>, vector<16x24xf32>
    %cst_23 = arith.constant dense<0xFF800000> : vector<16xf32>
    %45 = vector.multi_reduction <maximumf>, %44, %cst_23 [1] : vector<16x24xf32> to vector<16xf32>
    %46 = vector.shape_cast %45 : vector<16xf32> to vector<16x1xf32>
    %cst_24 = arith.constant 0.000000e+00 : f32
    %47 = vector.shape_cast %46 : vector<16x1xf32> to vector<16x1xf32>
    %48 = vector.broadcast %47 : vector<16x1xf32> to vector<16x24xf32>
    %49 = vector.broadcast %cst_24 : f32 to vector<16x24xf32>
    %50 = arith.select %42, %48, %49 : vector<16x24xi1>, vector<16x24xf32>
    %51 = arith.addf %25, %50 : vector<16x24xf32>
    %c12_i32_25 = arith.constant 12 : i32
    %52 = vector.broadcast %c12_i32_25 : i32 to vector<16x24xi32>
    %53 = arith.cmpi sge, %20, %52 : vector<16x24xi32>
    %c16_i32 = arith.constant 16 : i32
    %54 = vector.broadcast %c16_i32 : i32 to vector<16x24xi32>
    %55 = arith.cmpi slt, %20, %54 : vector<16x24xi32>
    %56 = arith.andi %53, %55 : vector<16x24xi1>
    %57 = arith.ori %31, %56 : vector<16x24xi1>
    %c16_i32_26 = arith.constant 16 : i32
    %58 = vector.broadcast %c16_i32_26 : i32 to vector<16x24xi32>
    %59 = arith.cmpi sge, %20, %58 : vector<16x24xi32>
    %c20_i32 = arith.constant 20 : i32
    %60 = vector.broadcast %c20_i32 : i32 to vector<16x24xi32>
    %61 = arith.cmpi slt, %20, %60 : vector<16x24xi32>
    %62 = arith.andi %59, %61 : vector<16x24xi1>
    %63 = arith.ori %37, %62 : vector<16x24xi1>
    %c20_i32_27 = arith.constant 20 : i32
    %64 = vector.broadcast %c20_i32_27 : i32 to vector<16x24xi32>
    %65 = arith.cmpi sge, %20, %64 : vector<16x24xi32>
    %c24_i32 = arith.constant 24 : i32
    %66 = vector.broadcast %c24_i32 : i32 to vector<16x24xi32>
    %67 = arith.cmpi slt, %20, %66 : vector<16x24xi32>
    %68 = arith.andi %65, %67 : vector<16x24xi1>
    %cst_28 = arith.constant 0xFF800000 : f32
    %69 = vector.broadcast %cst_28 : f32 to vector<16x24xf32>
    %70 = arith.select %68, %19, %69 : vector<16x24xi1>, vector<16x24xf32>
    %cst_29 = arith.constant dense<0xFF800000> : vector<16xf32>
    %71 = vector.multi_reduction <maximumf>, %70, %cst_29 [1] : vector<16x24xf32> to vector<16xf32>
    %72 = vector.shape_cast %71 : vector<16xf32> to vector<16x1xf32>
    %cst_30 = arith.constant 0.000000e+00 : f32
    %73 = vector.shape_cast %72 : vector<16x1xf32> to vector<16x1xf32>
    %74 = vector.broadcast %73 : vector<16x1xf32> to vector<16x24xf32>
    %75 = vector.broadcast %cst_30 : f32 to vector<16x24xf32>
    %76 = arith.select %68, %74, %75 : vector<16x24xi1>, vector<16x24xf32>
    %77 = arith.addf %51, %76 : vector<16x24xf32>
    %78 = arith.subf %19, %77 : vector<16x24xf32>
    %79 = math.exp %78 : vector<16x24xf32>
    %80 = arith.ori %57, %63 : vector<16x24xi1>
    %cst_31 = arith.constant dense<true> : vector<16x24xi1>
    %81 = arith.xori %80, %cst_31 : vector<16x24xi1>
    %cst_32 = arith.constant 0.000000e+00 : f32
    %82 = vector.broadcast %cst_32 : f32 to vector<16x24xf32>
    %83 = arith.select %81, %79, %82 : vector<16x24xi1>, vector<16x24xf32>
    %cst_33 = arith.constant 0.000000e+00 : f32
    %84 = vector.broadcast %cst_33 : f32 to vector<16x24xf32>
    %c0_i32_34 = arith.constant 0 : i32
    %85 = vector.broadcast %c0_i32_34 : i32 to vector<16x24xi32>
    %86 = arith.cmpi sge, %20, %85 : vector<16x24xi32>
    %c12_i32_35 = arith.constant 12 : i32
    %87 = vector.broadcast %c12_i32_35 : i32 to vector<16x24xi32>
    %88 = arith.cmpi slt, %20, %87 : vector<16x24xi32>
    %89 = arith.andi %86, %88 : vector<16x24xi1>
    %cst_36 = arith.constant 0.000000e+00 : f32
    %90 = vector.broadcast %cst_36 : f32 to vector<16x24xf32>
    %91 = arith.select %89, %83, %90 : vector<16x24xi1>, vector<16x24xf32>
    %cst_37 = arith.constant dense<0.000000e+00> : vector<16xf32>
    %92 = vector.multi_reduction <add>, %91, %cst_37 [1] : vector<16x24xf32> to vector<16xf32>
    %93 = vector.shape_cast %92 : vector<16xf32> to vector<16x1xf32>
    %cst_38 = arith.constant 0.000000e+00 : f32
    %94 = vector.shape_cast %93 : vector<16x1xf32> to vector<16x1xf32>
    %95 = vector.broadcast %94 : vector<16x1xf32> to vector<16x24xf32>
    %96 = vector.broadcast %cst_38 : f32 to vector<16x24xf32>
    %97 = arith.select %89, %95, %96 : vector<16x24xi1>, vector<16x24xf32>
    %98 = arith.addf %84, %97 : vector<16x24xf32>
    %c12_i32_39 = arith.constant 12 : i32
    %99 = vector.broadcast %c12_i32_39 : i32 to vector<16x24xi32>
    %100 = arith.cmpi sge, %20, %99 : vector<16x24xi32>
    %c24_i32_40 = arith.constant 24 : i32
    %101 = vector.broadcast %c24_i32_40 : i32 to vector<16x24xi32>
    %102 = arith.cmpi slt, %20, %101 : vector<16x24xi32>
    %103 = arith.andi %100, %102 : vector<16x24xi1>
    %cst_41 = arith.constant 0.000000e+00 : f32
    %104 = vector.broadcast %cst_41 : f32 to vector<16x24xf32>
    %105 = arith.select %103, %83, %104 : vector<16x24xi1>, vector<16x24xf32>
    %cst_42 = arith.constant dense<0.000000e+00> : vector<16xf32>
    %106 = vector.multi_reduction <add>, %105, %cst_42 [1] : vector<16x24xf32> to vector<16xf32>
    %107 = vector.shape_cast %106 : vector<16xf32> to vector<16x1xf32>
    %cst_43 = arith.constant 0.000000e+00 : f32
    %108 = vector.shape_cast %107 : vector<16x1xf32> to vector<16x1xf32>
    %109 = vector.broadcast %108 : vector<16x1xf32> to vector<16x24xf32>
    %110 = vector.broadcast %cst_43 : f32 to vector<16x24xf32>
    %111 = arith.select %103, %109, %110 : vector<16x24xi1>, vector<16x24xf32>
    %112 = arith.addf %98, %111 : vector<16x24xf32>
    %113 = tpu.reciprocal %112 : vector<16x24xf32> -> vector<16x24xf32>
    %114 = arith.mulf %83, %113 : vector<16x24xf32>
    %115 = arith.select %63, %79, %114 : vector<16x24xi1>, vector<16x24xf32>
    %116 = arith.select %57, %19, %115 : vector<16x24xi1>, vector<16x24xf32>
    %c0_44 = arith.constant 0 : index
    %c0_45 = arith.constant 0 : index
    %117 = vector.load %arg8[%c0_44, %c0_45] : memref<16x24xf32, #tpu.memory_space<vmem>>, vector<16x24xf32>
    tpu.vector_store %arg8[%c0_44, %c0_45], %116 {strides = array<i32>} : memref<16x24xf32, #tpu.memory_space<vmem>>, vector<16x24xf32>,
    return
  }
  func.func @transform_0(%arg0: i32) -> (i32, i32) {
    %c0_i32 = arith.constant 0 : i32
    %c0_i32_0 = arith.constant 0 : i32
    return %arg0, %c0_i32 : i32, i32
  }
  func.func @transform_1(%arg0: i32) -> (i32, i32) {
    %c0_i32 = arith.constant 0 : i32
    %c0_i32_0 = arith.constant 0 : i32
    %c0_i32_1 = arith.constant 0 : i32
    return %c0_i32, %c0_i32_0 : i32, i32
  }
  func.func @transform_2(%arg0: i32) -> (i32, i32) {
    %c0_i32 = arith.constant 0 : i32
    %c0_i32_0 = arith.constant 0 : i32
    %c0_i32_1 = arith.constant 0 : i32
    return %c0_i32, %c0_i32_0 : i32, i32
  }
  func.func @transform_3(%arg0: i32) -> (i32, i32) {
    %c0_i32 = arith.constant 0 : i32
    %c0_i32_0 = arith.constant 0 : i32
    %c0_i32_1 = arith.constant 0 : i32
    return %c0_i32, %c0_i32_0 : i32, i32
  }
  func.func @transform_4(%arg0: i32) -> (i32, i32) {
    %c0_i32 = arith.constant 0 : i32
    %c0_i32_0 = arith.constant 0 : i32
    %c0_i32_1 = arith.constant 0 : i32
    return %c0_i32, %c0_i32_0 : i32, i32
  }
  func.func @transform_5(%arg0: i32) -> (i32, i32) {
    %c0_i32 = arith.constant 0 : i32
    %c0_i32_0 = arith.constant 0 : i32
    %c0_i32_1 = arith.constant 0 : i32
    return %c0_i32, %c0_i32_0 : i32, i32
  }
  func.func @transform_6(%arg0: i32) -> (i32, i32) {
    %c0_i32 = arith.constant 0 : i32
    %c0_i32_0 = arith.constant 0 : i32
    %c0_i32_1 = arith.constant 0 : i32
    return %c0_i32, %c0_i32_0 : i32, i32
  }
  func.func @transform_7(%arg0: i32) -> (i32, i32) {
    %c0_i32 = arith.constant 0 : i32
    %c0_i32_0 = arith.constant 0 : i32
    return %arg0, %c0_i32 : i32, i32
  }
}

</mosaic_0001>

<bundles_post_ra>
// kernel: tpu_custom_call.1
= control target key start
LH: loop header
LB: loop body
LE: loop exit
PB: predicated region body
PF: predicated region fallthrough
CT: control target
= control target key end

     0   :  { %12 = vsyncpa [#allocation3], 0  ;;  %s756_s0 = inlined_call_operand.vmem [shape: f32[16,16], index: 0, kind: input, shape index: {}]   ;;  %s757_s1 = inlined_call_operand.hbm [shape: f32[16,32], index: 1, kind: input, shape index: {}]   ;;  %s758_s2 = inlined_call_operand.vmem [shape: f32[1,32], index: 2, kind: input, shape index: {}]   ;;  %s759_s3 = inlined_call_operand.vmem [shape: f32[32,32], index: 3, kind: input, shape index: {}]   ;;  %s760_s4 = inlined_call_operand.vmem [shape: f32[1,32], index: 4, kind: input, shape index: {}]   ;;  %s761_s5 = inlined_call_operand.vmem [shape: f32[32,24], index: 5, kind: input, shape index: {}]   ;;  %s762_s6 = inlined_call_operand.vmem [shape: f32[1,24], index: 6, kind: input, shape index: {}]   ;;  %s763_s7 = inlined_call_operand.hbm [shape: f32[16,24], index: 7, kind: output, shape index: {}]  }
   0x1   :  { %13 = vsyncpa [#allocation4], 0  ;;  %s547_s24 = smov [#allocation2]  }
   0x2   :  { %s21_s25 = sshll.u32 %s547_s24, 4  ;;  %s22_s25 = int_to_ptr.vmem [resolvable:$true] %s21_s25 }
   0x3   :  { %s511_s26 = scalar_lea.vmem %s22_s25, 256  ;;  %p516_p1 = scmp.lt.s32.totalorder %s22_s25, %s22_s25 }
   0x4   :  { %p512_p0 = scmp.ne.s32.totalorder %s22_s25, %s511_s26  ;;  %p517_p2 = scmp.lt.s32.totalorder %s511_s26, %s511_s26 }
   0x6   :  { %p518_p3 = por %p517_p2, %p516_p1 }
   0x8   :  { %p519_p4 = pnand %p518_p3, %p512_p0 }
   0xa   :  { %522 = shalt.err (!%p519_p4)
}
   0xb   :  { %s548_s27 = smov 128   ;;  %s549_s28 = smov 8  }
   0xc   :  { %27 = dma.hbm_to_vmem [thread:$0]  %s757_s1, 256, %s22_s25, [#allocation3], %s548_s27, %s548_s27, %s549_s28  }
   0xd   :  { %543 = dma.done.wait [#allocation3], 256  }
   0xe   :  { %544 = vsyncadd [#allocation3], 4294967040  ;;  %vm52_vm0 = vcmask 130048   ;;  %v44_v0 = vld [vmem:[#allocation2 + $0x8] sm:$0xff]  ;;  %v43_v1 = vld [vmem:[#allocation2] sm:$0xff]  ;;  %vm147_vm1 = vcmask 261120   ;;  %v323_v26 = vlaneseq }
   0xf   :  { %v41_v2 = vld [vmem:[%s756_s0] sm:$0xff]  ;;  %461 = vmatprep.subr.mxu0 %v44_v0  ;;  %v42_v3 = vld [vmem:[%s756_s0 + $0x8] sm:$0xff]  ;;  %v139_v4 = vld [vmem:[%s759_s3 + $0x18] sm:$0xff]  ;;  %vm339_vm8 = vcmask 195584  }
  0x10   :  { %465 = vmatprep.mubr.msk.f32.mxu0 %vm52_vm0, %v41_v2  ;;  %462 = vmatpush3.msra.mxu0 %v44_v0  ;;  %v138_v5 = vld [vmem:[%s759_s3 + $0x10] sm:$0xff]  ;;  %v137_v6 = vld [vmem:[%s759_s3 + $0x8] sm:$0xff]  ;;  %v136_v7 = vld [vmem:[%s759_s3] sm:$0xff]  ;;  %v638_v27 = vand.u32 127, %v323_v26 }
  0x11   :  { %463 = vmatprep.subr.mxu0 %v43_v1  ;;  %468 = vmatprep.subr.mxu1 %v139_v4  ;;  %v436_v8 = vld [vmem:[%s758_s2] ss:$0 sm:$0xff]  ;;  %v234_v15 = vld [vmem:[%s761_s5 + $0x18] sm:$0xff]  ;;  %v233_v16 = vld [vmem:[%s761_s5 + $0x10] sm:$0xff] }
  0x12   :  { %464 = vmatpush3.msra.mxu0 %v43_v1  ;;  %469 = vmatpush3.msra.mxu1 %v139_v4  ;;  %v232_v17 = vld [vmem:[%s761_s5 + $0x8] sm:$0xff]  ;;  %v231_v18 = vld [vmem:[%s761_s5] sm:$0xff]  ;;  %vm358_vm2 = vcmp.ge.s32.totalorder %v638_v27, 20  ;;  %vm359_vm3 = vcmp.lt.s32.totalorder %v638_v27, 24  ;;  %vm334_vm4 = vcmp.ge.s32.totalorder %v638_v27, 8  ;;  %vm335_vm5 = vcmp.lt.s32.totalorder %v638_v27, 12 }
  0x13   :  { %466 = vmatmul.mubr.msk.f32.vlgmr.msra.gmra.mxu0 %vm52_vm0, %v42_v3  ;;  %470 = vmatprep.subr.mxu1 %v138_v5  ;;  %v439_v19 = vld [vmem:[%s760_s4] ss:$0 sm:$0xff]  ;;  %vm653_vm6 = vmand %vm358_vm2, %vm359_vm3  ;;  %vm330_vm9 = vcmp.ge.s32.totalorder %v638_v27, 4  ;;  %vm331_vm10 = vcmp.lt.s32.totalorder %v638_v27, 8  ;;  %vm350_vm11 = vcmp.ge.s32.totalorder %v638_v27, 12  ;;  %vm351_vm12 = vcmp.lt.s32.totalorder %v638_v27, 16 }
  0x14   :  { %471 = vmatpush3.msra.mxu1 %v138_v5  ;;  %479 = vmatprep.subr.mxu0 %v234_v15  ;;  %v442_v29 = vld [vmem:[%s762_s6] ss:$0 sm:$0xff]  ;;  %vm659_vm7 = vmand %vm334_vm4, %vm335_vm5  ;;  %vm354_vm13 = vcmp.ge.s32.totalorder %v638_v27, 16  ;;  %vm355_vm14 = vcmp.lt.s32.totalorder %v638_v27, 20  ;;  %vm327_vm0 = vcmp.lt.s32.totalorder %v638_v27, 4  ;;  %s551_s4 = smov [#allocation5]  }
  0x15   :  { %472 = vmatprep.subr.mxu1 %v137_v6  ;;  %480 = vmatpush3.msra.mxu0 %v234_v15  ;;  %vm332_vm15 = vmand %vm330_vm9, %vm331_vm10  ;;  %vm550_vm9 = vmmov 1   ;;  %s424_s6 = sshll.u32 %s551_s4, 4  ;;  %s425_s6 = int_to_ptr.vmem [resolvable:$true] %s424_s6 }
  0x16   :  { %473 = vmatpush3.msra.mxu1 %v137_v6  ;;  %481 = vmatprep.subr.mxu0 %v233_v16  ;;  %vm356_vm2 = vmand %vm354_vm13, %vm355_vm14  ;;  %s523_s8 = scalar_lea.vmem %s425_s6, 256  ;;  %p528_p6 = scmp.lt.s32.totalorder %s425_s6, %s425_s6 }
  0x17   :  { %474 = vmatprep.subr.mxu1 %v136_v7  ;;  %482 = vmatpush3.msra.mxu0 %v233_v16  ;;  %p524_p5 = scmp.ne.s32.totalorder %s425_s6, %s523_s8  ;;  %p529_p7 = scmp.lt.s32.totalorder %s523_s8, %s523_s8 }
  0x18   :  { %475 = vmatpush3.msra.mxu1 %v136_v7  ;;  %483 = vmatprep.subr.mxu0 %v232_v17 }
  0x19   :  { %484 = vmatpush3.msra.mxu0 %v232_v17  ;;  %p530_p8 = por %p529_p7, %p528_p6 }
  0x1a   :  { %485 = vmatprep.subr.mxu0 %v231_v18 }
  0x1b   :  { %486 = vmatpush3.msra.mxu0 %v231_v18  ;;  %p531_p9 = pnand %p530_p8, %p524_p5 }
  0xd3   :  { %v467_v9 = vpop.f32.mrf.mxu0 }
  0xd4   :  { %v131_v10 = vadd.f32 %v467_v9, %v436_v8 }
  0xd5   :  { %v125_v11 = vpop.f32.mrf.mxu0 }
  0xd6   :  { %v126_v12 = vadd.f32 %v436_v8, %v125_v11  ;;  %v135_v14 = vmax.f32 %v131_v10, 0.0 }
  0xd8   :  { %v134_v13 = vmax.f32 %v126_v12, 0.0 }
  0xda   :  { %476 = vmatprep.mubr.msk.f32.mxu1 %vm147_vm1, %v134_v13 }
  0xdb   :  { %477 = vmatmul.mubr.msk.f32.vlgmr.msra.gmra.mxu1 %vm147_vm1, %v135_v14 }
 0x19b   :  { %v478_v20 = vpop.f32.mrf.mxu1 }
 0x19c   :  { %v226_v21 = vadd.f32 %v478_v20, %v439_v19 }
 0x19d   :  { %v220_v22 = vpop.f32.mrf.mxu1 }
 0x19e   :  { %v221_v23 = vadd.f32 %v439_v19, %v220_v22  ;;  %v230_v25 = vmax.f32 %v226_v21, 0.0 }
 0x1a0   :  { %v229_v24 = vmax.f32 %v221_v23, 0.0 }
 0x1a2   :  { %487 = vmatprep.mubr.msk.f32.mxu0 %vm147_vm1, %v229_v24 }
 0x1a3   :  { %488 = vmatmul.mubr.msk.f32.vlgmr.msra.gmra.mxu0 %vm147_vm1, %v230_v25  ;;  %vm352_vm1 = vmand %vm350_vm11, %vm351_vm12 }
 0x1a4   :  { %vm698_vm4 = vmor %vm327_vm0, %vm352_vm1 }
 0x1a5   :  { %vm714_vm12 = vmand %vm350_vm11, %vm359_vm3 }
 0x263   :  { %v489_v28 = vpop.f32.mrf.mxu0 }
 0x264   :  { %v647_v31 = vadd.f32 %v489_v28, %v442_v29 }
 0x265   :  { %v314_v30 = vpop.f32.mrf.mxu0 }
 0x266   :  { %v649_v32 = vadd.f32 %v442_v29, %v314_v30  ;;  %v362_v39 = vsel %vm653_vm6, %v647_v31, -inf  ;;  %v338_v40 = vsel %vm659_vm7, %v647_v31, -inf }
 0x267   :  { %v366_v41 = vsel %vm339_vm8, %v362_v39, -inf  ;;  %v343_v42 = vsel %vm339_vm8, %v338_v40, -inf }
 0x268   :  { %v361_v35 = vsel %vm653_vm6, %v649_v32, -inf  ;;  %v337_v36 = vsel %vm659_vm7, %v649_v32, -inf }
 0x269   :  { %v363_v37 = vsel %vm339_vm8, %v361_v35, -inf  ;;  %v340_v38 = vsel %vm339_vm8, %v337_v36, -inf }
 0x26a   :  { %364 = vmax.xlane.f32.xlu1 %v363_v37  ;;  %341 = vmax.xlane.f32.xlu0 %v340_v38 }
 0x26e   :  { %367 = vmax.xlane.f32.xlu1 %v366_v41  ;;  %344 = vmax.xlane.f32.xlu0 %v343_v42 }
 0x2f3   :  { %v365_v43 = vpop.xlane.xlu1 %364  ;;  %v342_v44 = vpop.xlane.xlu0 %341 }
 0x2f4   :  { %v369_v45 = vsel %vm653_vm6, %v365_v43, 0.0  ;;  %v346_v46 = vsel %vm659_vm7, %v342_v44, 0.0 }
 0x2f5   :  { %v371_v47 = vadd.f32 %v369_v45, %v346_v46 }
 0x2f7   :  { %v373_v48 = vsub.f32 %v649_v32, %v371_v47  ;;  %v368_v49 = vpop.xlane.xlu1 %367  ;;  %v345_v50 = vpop.xlane.xlu0 %344 }
 0x2f8   :  { %v370_v51 = vsel %vm653_vm6, %v368_v49, 0.0  ;;  %v347_v52 = vsel %vm659_vm7, %v345_v50, 0.0  ;;  %vm702_vm6 = vmor %vm332_vm15, %vm356_vm2 }
 0x2f9   :  { %v375_v53 = vmul.f32 1.442695, %v373_v48  ;;  %v372_v54 = vadd.f32 %v370_v51, %v347_v52  ;;  %vm379_vm7 = vmor %vm698_vm4, %vm702_vm6 }
 0x2fa   :  { %vm380_vm10 = vmxor %vm379_vm7, %vm550_vm9 }
 0x2fb   :  { %495 = vpow2.f32 %v375_v53  ;;  %v374_v55 = vsub.f32 %v647_v31, %v372_v54 }
 0x2fd   :  { %v377_v56 = vmul.f32 1.442695, %v374_v55 }
 0x2ff   :  { %497 = vpow2.f32 %v377_v56 }
 0x308   :  { %v496_v59 = vpop.eup %495 }
 0x309   :  { %v381_v60 = vsel %vm380_vm10, %v496_v59, 0.0 }
 0x30a   :  { %v384_v62 = vsel %vm335_vm5, %v381_v60, 0.0  ;;  %v397_v1 = vsel %vm714_vm12, %v381_v60, 0.0 }
 0x30b   :  { %v386_v63 = vsel %vm339_vm8, %v384_v62, 0.0  ;;  %v399_v4 = vsel %vm339_vm8, %v397_v1, 0.0 }
 0x30c   :  { %v498_v0 = vpop.eup %497  ;;  %387 = vadd.xlane.f32.xlu0 %v386_v63 }
 0x30d   :  { %v382_v2 = vsel %vm380_vm10, %v498_v0, 0.0 }
 0x30e   :  { %v385_v3 = vsel %vm335_vm5, %v382_v2, 0.0  ;;  %v398_v6 = vsel %vm714_vm12, %v382_v2, 0.0 }
 0x30f   :  { %v389_v5 = vsel %vm339_vm8, %v385_v3, 0.0  ;;  %v402_v7 = vsel %vm339_vm8, %v398_v6, 0.0 }
 0x310   :  { %400 = vadd.xlane.f32.xlu0 %v399_v4  ;;  %390 = vadd.xlane.f32.xlu1 %v389_v5 }
 0x314   :  { %403 = vadd.xlane.f32.xlu1 %v402_v7 }
 0x395   :  { %v388_v8 = vpop.xlane.xlu0 %387 }
 0x396   :  { %v392_v11 = vsel %vm335_vm5, %v388_v8, 0.0 }
 0x399   :  { %v391_v9 = vpop.xlane.xlu1 %390  ;;  %v401_v10 = vpop.xlane.xlu0 %400 }
 0x39a   :  { %v405_v12 = vsel %vm714_vm12, %v401_v10, 0.0  ;;  %v393_v15 = vsel %vm335_vm5, %v391_v9, 0.0 }
 0x39b   :  { %v407_v13 = vadd.f32 %v405_v12, %v392_v11 }
 0x39d   :  { %499 = vrcp.f32 %v407_v13  ;;  %v404_v14 = vpop.xlane.xlu1 %403 }
 0x39e   :  { %v406_v16 = vsel %vm714_vm12, %v404_v14, 0.0 }
 0x39f   :  { %v408_v17 = vadd.f32 %v406_v16, %v393_v15 }
 0x3a1   :  { %501 = vrcp.f32 %v408_v17 }
 0x3aa   :  { %v500_v18 = vpop.eup %499 }
 0x3ab   :  { %v411_v19 = vmul.f32 %v500_v18, %v381_v60 }
 0x3ad   :  { %v413_v20 = vsel %vm702_vm6, %v496_v59, %v411_v19 }
 0x3ae   :  { %v502_v21 = vpop.eup %501  ;;  %v415_v22 = vsel %vm698_vm4, %v649_v32, %v413_v20 }
 0x3af   :  { %v412_v23 = vmul.f32 %v502_v21, %v382_v2  ;;  %417 = vst.msk [vmem:[#allocation5] sm:$0xff] %vm339_vm8, %v415_v22 }
 0x3b1   :  { %v414_v24 = vsel %vm702_vm6, %v498_v0, %v412_v23 }
 0x3b2   :  { %v416_v25 = vsel %vm698_vm4, %v647_v31, %v414_v24 }
 0x3b3   :  { %418 = vst.msk [vmem:[#allocation5 + $0x8] sm:$0xff] %vm339_vm8, %v416_v25 }
 0x3b4   :  { %534 = shalt.err (!%p531_p9)
}
 0x3b5   :  { %430 = dma.vmem_to_hbm [thread:$0]  %s425_s6, 256, %s763_s7, [#allocation4], %s548_s27, %s548_s27, %s549_s28  }
 0x3b6   :  { %545 = dma.done.wait [#allocation4], 256  }
 0x3b7   :  { %546 = vsyncadd [#allocation4], 4294967040 }
 0x3b8   :  { %434 = vsyncpa [#allocation3], 1 }
 0x3b9   :  { %435 = vsyncpa [#allocation4], 1 }

</bundles_post_ra>
